<compile_context>
chip_gen: v5e
topology: v5e:2x2
jax: 0.10.0
libtpu: 0.0.40
codegen_flags: <defaults>
</compile_context>

<pallas_src>
import jax
import jax.numpy as jnp
from jax.experimental import pallas as pl
from jax.experimental.pallas import tpu as pltpu

NEG_SLOPE = 0.01  # nn.LeakyReLU() default used inside every block


def _stack_block_weights(w1, b1, w2, b2):
    """Pack one DilatedCausalConv1d block into a single contraction.

        [y1_pre]   [w1[:,:,0]  w1[:,:,1]]   [x[:, 0:Lo]  ]   [b1]
        [y2    ] = [    0         w2    ] @ [x[:, d:d+Lo]] + [b2]

    Returns W_stk (2*C_out, 2*C_in) and b_stk (2*C_out, 1).
    """
    C_out, C_in, K = w1.shape
    assert K == 2, "forward() of DilatedCausalConv1d requires kernel_size == 2"
    top = jnp.concatenate([w1[:, :, 0], w1[:, :, 1]], axis=1)
    bot = jnp.concatenate([jnp.zeros((C_out, C_in), w2.dtype), w2], axis=1)
    W = jnp.concatenate([top, bot], axis=0)
    b = jnp.concatenate([b1, b2], axis=0).reshape(2 * C_out, 1)
    return W, b


def make_ccnn(B, num_channels, hidden_channels, L, dilations):
    n_layers = len(hidden_channels)
    chans = [num_channels] + list(hidden_channels)

    # kernel_size == 2  =>  each block trims `dilation` samples off the end.
    L_outs, Lc = [], L
    for d in dilations:
        Lc -= d
        L_outs.append(Lc)
    L_final = L_outs[-1]

    def kernel(x_ref, *refs):
        *wb_refs, wout_ref, o_ref = refs
        x = x_ref[0].astype(jnp.float32)                  # (C0, L), f32 in VMEM
        for i in range(n_layers):                         # static unroll
            d, Lo, C_out = dilations[i], L_outs[i], chans[i + 1]
            W = wb_refs[2 * i][...].astype(jnp.float32)   # (2*C_out, 2*C_in)
            b = wb_refs[2 * i + 1][...]                   # (2*C_out, 1), f32
            # Stack both dilated taps + the skip input along the contraction
            # axis: the whole block is ONE MXU push.
            x_stk = jnp.concatenate([x[:, :Lo], x[:, d:d + Lo]], axis=0)
            acc = jnp.dot(W, x_stk, preferred_element_type=jnp.float32) + b
            y1, y2 = acc[:C_out], acc[C_out:]
            x = jnp.where(y1 >= 0, y1, NEG_SLOPE * y1) + y2   # LeakyReLU + skip
        # 1x1 output conv (bias-free) + sigmoid.
        z = jnp.dot(wout_ref[...].astype(jnp.float32), x,
                    preferred_element_type=jnp.float32)
        o_ref[0] = (1.0 / (1.0 + jnp.exp(-z))).astype(o_ref.dtype)

    const2 = lambda b_idx: (0, 0)                         # grid-invariant inputs
    in_specs = [pl.BlockSpec((1, chans[0], L), lambda b_idx: (b_idx, 0, 0))]
    for i in range(n_layers):
        in_specs.append(pl.BlockSpec((2 * chans[i + 1], 2 * chans[i]), const2))
        in_specs.append(pl.BlockSpec((2 * chans[i + 1], 1), const2))
    in_specs.append(pl.BlockSpec((num_channels, chans[-1]), const2))

    grid_spec = pltpu.PrefetchScalarGridSpec(
        num_scalar_prefetch=0,
        grid=(B,),                                        # parallel over batch
        in_specs=in_specs,
        out_specs=pl.BlockSpec((1, num_channels, L_final),
                               lambda b_idx: (b_idx, 0, 0)),
    )

    fused = pl.pallas_call(
        kernel,
        out_shape=jax.ShapeDtypeStruct((B, num_channels, L_final), jnp.float32),
        grid_spec=grid_spec,
        compiler_params=pltpu.CompilerParams(
            dimension_semantics=("parallel",),
            vmem_limit_bytes=32 * 1024 * 1024,
        ),
    )

    def apply(inp, layer_params, w_out):
        # inp: (L, B, C) exactly as the PyTorch module receives it.
        x = jnp.transpose(inp, (1, 2, 0)).astype(jnp.bfloat16)   # NCL, bf16 HBM
        args = [x]
        for (w1, b1, w2, b2) in layer_params:
            W, b = _stack_block_weights(w1, b1, w2, b2)
            args.append(W.astype(jnp.bfloat16))
            args.append(b.astype(jnp.float32))
        args.append(w_out.astype(jnp.bfloat16))
        y = fused(*args)                                  # (B, C_out, L_final)
        # TODO(synk): the `inference=True` branch (torch.cat([inp[1:], x], 0))
        # is a host-side concat and is not implemented (default is False).
        return jnp.transpose(y, (2, 0, 1))                # (L_final, B, C_out)

    return jax.jit(apply), L_final


def ccnn_reference(inp, layer_params, w_out, dilations):
    """Pure-JAX f32 mirror of CCNN.forward (inference=False)."""
    x = jnp.transpose(inp, (1, 2, 0)).astype(jnp.float32)         # (B, C, L)
    for (w1, b1, w2, b2), d in zip(layer_params, dilations):
        Lo = x.shape[-1] - d
        y1 = (jnp.einsum("oc,bct->bot", w1[:, :, 0], x[:, :, :Lo],
                         precision="highest")
              + jnp.einsum("oc,bct->bot", w1[:, :, 1], x[:, :, d:d + Lo],
                           precision="highest")
              + b1[None, :, None])
        y1 = jnp.where(y1 >= 0, y1, NEG_SLOPE * y1)
        y2 = (jnp.einsum("oc,bct->bot", w2, x[:, :, d:d + Lo],
                         precision="highest")
              + b2[None, :, None])
        x = y1 + y2
    z = jnp.einsum("oc,bct->bot", w_out, x, precision="highest")
    return jnp.transpose(jax.nn.sigmoid(z), (2, 0, 1))            # (L', B, C)


if __name__ == "__main__":
    B = 2
    num_channels = 4
    hidden_channels = [8, 8, 8]          # multiples of 8 -> sublane friendly
    K = 2                                # required by the module's forward
    dilations = [2 ** i for i in range(len(hidden_channels))]     # [1, 2, 4]
    L = 128 + sum(dilations)             # 135 -> final output length is 128

    key = jax.random.PRNGKey(0)
    key, kx = jax.random.split(key)
    inp = jax.random.normal(kx, (L, B, num_channels), dtype=jnp.float32)

    chans = [num_channels] + hidden_channels
    layer_params = []
    for i in range(len(hidden_channels)):
        key, k1, k2, k3, k4 = jax.random.split(key, 5)
        C_in, C_out = chans[i], chans[i + 1]
        # kaiming_normal_ (fan_in, a=0 -> gain sqrt(2)); small nonzero biases
        # so the bias path is actually exercised (PyTorch init zeroes them).
        w1 = (2.0 / (C_in * K)) ** 0.5 * jax.random.normal(
            k1, (C_out, C_in, K), dtype=jnp.float32)
        w2 = (2.0 / C_in) ** 0.5 * jax.random.normal(
            k2, (C_out, C_in), dtype=jnp.float32)
        b1 = 0.1 * jax.random.normal(k3, (C_out,), dtype=jnp.float32)
        b2 = 0.1 * jax.random.normal(k4, (C_out,), dtype=jnp.float32)
        layer_params.append((w1, b1, w2, b2))
    key, ko = jax.random.split(key)
    w_out = (2.0 / chans[-1]) ** 0.5 * jax.random.normal(
        ko, (num_channels, chans[-1]), dtype=jnp.float32)

    apply_fn, L_final = make_ccnn(B, num_channels, hidden_channels, L, dilations)
    out = jax.block_until_ready(apply_fn(inp, layer_params, w_out))

    # The kernel consumes bf16-rounded x / weights (boundary cast); compare
    # against an f32 reference fed the same rounded values.
    rd = lambda a: a.astype(jnp.bfloat16).astype(jnp.float32)
    ref = ccnn_reference(
        rd(inp),
        [(rd(w1), b1, rd(w2), b2) for (w1, b1, w2, b2) in layer_params],
        rd(w_out), dilations)

    assert out.shape == (L_final, B, num_channels), out.shape
    max_err = float(jnp.max(jnp.abs(out - ref)))
    assert jnp.allclose(out, ref, atol=1e-3, rtol=1e-3), f"mismatch: {max_err}"

    print("KERNEL_OK")
</pallas_src>

<mosaic_0001>
module attributes {stable_mosaic.version = 11 : i64} {
  func.func @kernel(%arg0: i32, %arg1: memref<1x4x135xbf16, #tpu.memory_space<vmem>>, %arg2: memref<16x8xbf16, #tpu.memory_space<vmem>>, %arg3: memref<16x1xf32, #tpu.memory_space<vmem>>, %arg4: memref<16x16xbf16, #tpu.memory_space<vmem>>, %arg5: memref<16x1xf32, #tpu.memory_space<vmem>>, %arg6: memref<16x16xbf16, #tpu.memory_space<vmem>>, %arg7: memref<16x1xf32, #tpu.memory_space<vmem>>, %arg8: memref<4x8xbf16, #tpu.memory_space<vmem>>, %arg9: memref<1x4x128xf32, #tpu.memory_space<vmem>>) attributes {dimension_semantics = [#tpu.dimension_semantics<parallel>], iteration_bounds = array<i64: 2>, scalar_prefetch = 0 : i64, scratch_operands = 0 : i64, tpu.core_type = #tpu.core_type<tc>, window_params = [{transform_indices = @transform_0, window_bounds = array<i64: 1, 4, 135>}, {pipeline_mode = #tpu.pipeline_mode<synchronous>, transform_indices = @transform_1, window_bounds = array<i64: 16, 8>}, {pipeline_mode = #tpu.pipeline_mode<synchronous>, transform_indices = @transform_2, window_bounds = array<i64: 16, 1>}, {pipeline_mode = #tpu.pipeline_mode<synchronous>, transform_indices = @transform_3, window_bounds = array<i64: 16, 16>}, {pipeline_mode = #tpu.pipeline_mode<synchronous>, transform_indices = @transform_4, window_bounds = array<i64: 16, 1>}, {pipeline_mode = #tpu.pipeline_mode<synchronous>, transform_indices = @transform_5, window_bounds = array<i64: 16, 16>}, {pipeline_mode = #tpu.pipeline_mode<synchronous>, transform_indices = @transform_6, window_bounds = array<i64: 16, 1>}, {pipeline_mode = #tpu.pipeline_mode<synchronous>, transform_indices = @transform_7, window_bounds = array<i64: 4, 8>}, {transform_indices = @transform_8, window_bounds = array<i64: 1, 4, 128>}]} {
    %c0 = arith.constant 0 : index
    %c0_0 = arith.constant 0 : index
    %c0_1 = arith.constant 0 : index
    %0 = vector.load %arg1[%c0, %c0_0, %c0_1] : memref<1x4x135xbf16, #tpu.memory_space<vmem>>, vector<1x4x135xbf16>
    %1 = vector.shape_cast %0 : vector<1x4x135xbf16> to vector<4x135xbf16>
    %2 = arith.extf %1 : vector<4x135xbf16> to vector<4x135xf32>
    %c0_2 = arith.constant 0 : index
    %c0_3 = arith.constant 0 : index
    %3 = vector.load %arg2[%c0_2, %c0_3] : memref<16x8xbf16, #tpu.memory_space<vmem>>, vector<16x8xbf16>
    %4 = arith.extf %3 : vector<16x8xbf16> to vector<16x8xf32>
    %c0_4 = arith.constant 0 : index
    %c0_5 = arith.constant 0 : index
    %5 = vector.load %arg3[%c0_4, %c0_5] : memref<16x1xf32, #tpu.memory_space<vmem>>, vector<16x1xf32>
    %6 = vector.extract_strided_slice %2 {offsets = [0, 0], sizes = [4, 134], strides = [1, 1]} : vector<4x135xf32> to vector<4x134xf32>
    %7 = vector.extract_strided_slice %2 {offsets = [0, 1], sizes = [4, 134], strides = [1, 1]} : vector<4x135xf32> to vector<4x134xf32>
    %8 = tpu.concatenate %6, %7 in 0 : vector<4x134xf32>, vector<4x134xf32> -> vector<8x134xf32>
    %cst = arith.constant dense<0.000000e+00> : vector<16x134xf32>
    %9 = tpu.matmul %4, %8, %cst {dimension_numbers = #tpu.dot_dimension_numbers<[1], [0], [0], [1], [0, 0, 1, 1], [], []>} : vector<16x8xf32>, vector<8x134xf32>, vector<16x134xf32> -> vector<16x134xf32>
    %10 = vector.broadcast %5 : vector<16x1xf32> to vector<16x134xf32>
    %11 = arith.addf %9, %10 : vector<16x134xf32>
    %12 = vector.extract_strided_slice %11 {offsets = [0, 0], sizes = [8, 134], strides = [1, 1]} : vector<16x134xf32> to vector<8x134xf32>
    %13 = vector.extract_strided_slice %11 {offsets = [8, 0], sizes = [8, 134], strides = [1, 1]} : vector<16x134xf32> to vector<8x134xf32>
    %cst_6 = arith.constant 0.000000e+00 : f32
    %14 = vector.broadcast %cst_6 : f32 to vector<8x134xf32>
    %15 = arith.cmpf oge, %12, %14 : vector<8x134xf32>
    %cst_7 = arith.constant 0.00999999977 : f32
    %16 = vector.broadcast %cst_7 : f32 to vector<8x134xf32>
    %17 = arith.mulf %16, %12 : vector<8x134xf32>
    %18 = arith.select %15, %12, %17 : vector<8x134xi1>, vector<8x134xf32>
    %19 = arith.addf %18, %13 : vector<8x134xf32>
    %c0_8 = arith.constant 0 : index
    %c0_9 = arith.constant 0 : index
    %20 = vector.load %arg4[%c0_8, %c0_9] : memref<16x16xbf16, #tpu.memory_space<vmem>>, vector<16x16xbf16>
    %21 = arith.extf %20 : vector<16x16xbf16> to vector<16x16xf32>
    %c0_10 = arith.constant 0 : index
    %c0_11 = arith.constant 0 : index
    %22 = vector.load %arg5[%c0_10, %c0_11] : memref<16x1xf32, #tpu.memory_space<vmem>>, vector<16x1xf32>
    %23 = vector.extract_strided_slice %19 {offsets = [0, 0], sizes = [8, 132], strides = [1, 1]} : vector<8x134xf32> to vector<8x132xf32>
    %24 = vector.extract_strided_slice %19 {offsets = [0, 2], sizes = [8, 132], strides = [1, 1]} : vector<8x134xf32> to vector<8x132xf32>
    %25 = tpu.concatenate %23, %24 in 0 : vector<8x132xf32>, vector<8x132xf32> -> vector<16x132xf32>
    %cst_12 = arith.constant dense<0.000000e+00> : vector<16x132xf32>
    %26 = tpu.matmul %21, %25, %cst_12 {dimension_numbers = #tpu.dot_dimension_numbers<[1], [0], [0], [1], [0, 0, 1, 1], [], []>} : vector<16x16xf32>, vector<16x132xf32>, vector<16x132xf32> -> vector<16x132xf32>
    %27 = vector.broadcast %22 : vector<16x1xf32> to vector<16x132xf32>
    %28 = arith.addf %26, %27 : vector<16x132xf32>
    %29 = vector.extract_strided_slice %28 {offsets = [0, 0], sizes = [8, 132], strides = [1, 1]} : vector<16x132xf32> to vector<8x132xf32>
    %30 = vector.extract_strided_slice %28 {offsets = [8, 0], sizes = [8, 132], strides = [1, 1]} : vector<16x132xf32> to vector<8x132xf32>
    %cst_13 = arith.constant 0.000000e+00 : f32
    %31 = vector.broadcast %cst_13 : f32 to vector<8x132xf32>
    %32 = arith.cmpf oge, %29, %31 : vector<8x132xf32>
    %cst_14 = arith.constant 0.00999999977 : f32
    %33 = vector.broadcast %cst_14 : f32 to vector<8x132xf32>
    %34 = arith.mulf %33, %29 : vector<8x132xf32>
    %35 = arith.select %32, %29, %34 : vector<8x132xi1>, vector<8x132xf32>
    %36 = arith.addf %35, %30 : vector<8x132xf32>
    %c0_15 = arith.constant 0 : index
    %c0_16 = arith.constant 0 : index
    %37 = vector.load %arg6[%c0_15, %c0_16] : memref<16x16xbf16, #tpu.memory_space<vmem>>, vector<16x16xbf16>
    %38 = arith.extf %37 : vector<16x16xbf16> to vector<16x16xf32>
    %c0_17 = arith.constant 0 : index
    %c0_18 = arith.constant 0 : index
    %39 = vector.load %arg7[%c0_17, %c0_18] : memref<16x1xf32, #tpu.memory_space<vmem>>, vector<16x1xf32>
    %40 = vector.extract_strided_slice %36 {offsets = [0, 0], sizes = [8, 128], strides = [1, 1]} : vector<8x132xf32> to vector<8x128xf32>
    %41 = vector.extract_strided_slice %36 {offsets = [0, 4], sizes = [8, 128], strides = [1, 1]} : vector<8x132xf32> to vector<8x128xf32>
    %42 = tpu.concatenate %40, %41 in 0 : vector<8x128xf32>, vector<8x128xf32> -> vector<16x128xf32>
    %cst_19 = arith.constant dense<0.000000e+00> : vector<16x128xf32>
    %43 = tpu.matmul %38, %42, %cst_19 {dimension_numbers = #tpu.dot_dimension_numbers<[1], [0], [0], [1], [0, 0, 1, 1], [], []>} : vector<16x16xf32>, vector<16x128xf32>, vector<16x128xf32> -> vector<16x128xf32>
    %44 = vector.broadcast %39 : vector<16x1xf32> to vector<16x128xf32>
    %45 = arith.addf %43, %44 : vector<16x128xf32>
    %46 = vector.extract_strided_slice %45 {offsets = [0, 0], sizes = [8, 128], strides = [1, 1]} : vector<16x128xf32> to vector<8x128xf32>
    %47 = vector.extract_strided_slice %45 {offsets = [8, 0], sizes = [8, 128], strides = [1, 1]} : vector<16x128xf32> to vector<8x128xf32>
    %cst_20 = arith.constant 0.000000e+00 : f32
    %48 = vector.broadcast %cst_20 : f32 to vector<8x128xf32>
    %49 = arith.cmpf oge, %46, %48 : vector<8x128xf32>
    %cst_21 = arith.constant 0.00999999977 : f32
    %50 = vector.broadcast %cst_21 : f32 to vector<8x128xf32>
    %51 = arith.mulf %50, %46 : vector<8x128xf32>
    %52 = arith.select %49, %46, %51 : vector<8x128xi1>, vector<8x128xf32>
    %53 = arith.addf %52, %47 : vector<8x128xf32>
    %c0_22 = arith.constant 0 : index
    %c0_23 = arith.constant 0 : index
    %54 = vector.load %arg8[%c0_22, %c0_23] : memref<4x8xbf16, #tpu.memory_space<vmem>>, vector<4x8xbf16>
    %55 = arith.extf %54 : vector<4x8xbf16> to vector<4x8xf32>
    %cst_24 = arith.constant dense<0.000000e+00> : vector<4x128xf32>
    %56 = tpu.matmul %55, %53, %cst_24 {dimension_numbers = #tpu.dot_dimension_numbers<[1], [0], [0], [1], [0, 0, 1, 1], [], []>} : vector<4x8xf32>, vector<8x128xf32>, vector<4x128xf32> -> vector<4x128xf32>
    %cst_25 = arith.constant 0.000000e+00 : f32
    %57 = vector.broadcast %cst_25 : f32 to vector<4x128xf32>
    %58 = arith.subf %57, %56 : vector<4x128xf32>
    %59 = math.exp %58 : vector<4x128xf32>
    %cst_26 = arith.constant 1.000000e+00 : f32
    %60 = vector.broadcast %cst_26 : f32 to vector<4x128xf32>
    %61 = arith.addf %60, %59 : vector<4x128xf32>
    %cst_27 = arith.constant 1.000000e+00 : f32
    %62 = vector.broadcast %cst_27 : f32 to vector<4x128xf32>
    %63 = arith.divf %62, %61 : vector<4x128xf32>
    %c0_28 = arith.constant 0 : index
    %c0_29 = arith.constant 0 : index
    %c0_30 = arith.constant 0 : index
    %64 = vector.load %arg9[%c0_28, %c0_29, %c0_30] : memref<1x4x128xf32, #tpu.memory_space<vmem>>, vector<1x4x128xf32>
    %65 = vector.shape_cast %64 : vector<1x4x128xf32> to vector<4x128xf32>
    %66 = vector.shape_cast %63 : vector<4x128xf32> to vector<1x4x128xf32>
    tpu.vector_store %arg9[%c0_28, %c0_29, %c0_30], %66 {strides = array<i32>} : memref<1x4x128xf32, #tpu.memory_space<vmem>>, vector<1x4x128xf32>,
    return
  }
  func.func @transform_0(%arg0: i32) -> (i32, i32, i32) {
    %c0_i32 = arith.constant 0 : i32
    %c0_i32_0 = arith.constant 0 : i32
    %c0_i32_1 = arith.constant 0 : i32
    return %arg0, %c0_i32, %c0_i32_0 : i32, i32, i32
  }
  func.func @transform_1(%arg0: i32) -> (i32, i32) {
    %c0_i32 = arith.constant 0 : i32
    %c0_i32_0 = arith.constant 0 : i32
    %c0_i32_1 = arith.constant 0 : i32
    return %c0_i32, %c0_i32_0 : i32, i32
  }
  func.func @transform_2(%arg0: i32) -> (i32, i32) {
    %c0_i32 = arith.constant 0 : i32
    %c0_i32_0 = arith.constant 0 : i32
    %c0_i32_1 = arith.constant 0 : i32
    return %c0_i32, %c0_i32_0 : i32, i32
  }
  func.func @transform_3(%arg0: i32) -> (i32, i32) {
    %c0_i32 = arith.constant 0 : i32
    %c0_i32_0 = arith.constant 0 : i32
    %c0_i32_1 = arith.constant 0 : i32
    return %c0_i32, %c0_i32_0 : i32, i32
  }
  func.func @transform_4(%arg0: i32) -> (i32, i32) {
    %c0_i32 = arith.constant 0 : i32
    %c0_i32_0 = arith.constant 0 : i32
    %c0_i32_1 = arith.constant 0 : i32
    return %c0_i32, %c0_i32_0 : i32, i32
  }
  func.func @transform_5(%arg0: i32) -> (i32, i32) {
    %c0_i32 = arith.constant 0 : i32
    %c0_i32_0 = arith.constant 0 : i32
    %c0_i32_1 = arith.constant 0 : i32
    return %c0_i32, %c0_i32_0 : i32, i32
  }
  func.func @transform_6(%arg0: i32) -> (i32, i32) {
    %c0_i32 = arith.constant 0 : i32
    %c0_i32_0 = arith.constant 0 : i32
    %c0_i32_1 = arith.constant 0 : i32
    return %c0_i32, %c0_i32_0 : i32, i32
  }
  func.func @transform_7(%arg0: i32) -> (i32, i32) {
    %c0_i32 = arith.constant 0 : i32
    %c0_i32_0 = arith.constant 0 : i32
    %c0_i32_1 = arith.constant 0 : i32
    return %c0_i32, %c0_i32_0 : i32, i32
  }
  func.func @transform_8(%arg0: i32) -> (i32, i32, i32) {
    %c0_i32 = arith.constant 0 : i32
    %c0_i32_0 = arith.constant 0 : i32
    %c0_i32_1 = arith.constant 0 : i32
    return %arg0, %c0_i32, %c0_i32_0 : i32, i32, i32
  }
}

</mosaic_0001>

<bundles_post_ra>
// kernel: apply.1
= control target key start
LH: loop header
LB: loop body
LE: loop exit
PB: predicated region body
PF: predicated region fallthrough
CT: control target
= control target key end

     0   :  { %13 = vsyncpa [#allocation3], 0  ;;  %s1009_s0 = inlined_call_operand.vmem [shape: bf16[2,4,135], index: 0, kind: input, shape index: {}]   ;;  %s1010_s1 = inlined_call_operand.vmem [shape: bf16[16,8], index: 1, kind: input, shape index: {}]   ;;  %s1011_s2 = inlined_call_operand.vmem [shape: f32[16,1], index: 2, kind: input, shape index: {}]   ;;  %s1012_s3 = inlined_call_operand.vmem [shape: bf16[16,16], index: 3, kind: input, shape index: {}]   ;;  %s1013_s4 = inlined_call_operand.vmem [shape: f32[16,1], index: 4, kind: input, shape index: {}]   ;;  %s1014_s5 = inlined_call_operand.vmem [shape: bf16[16,16], index: 5, kind: input, shape index: {}]   ;;  %s1015_s6 = inlined_call_operand.vmem [shape: f32[16,1], index: 6, kind: input, shape index: {}]   ;;  %s1016_s7 = inlined_call_operand.vmem [shape: bf16[4,8], index: 7, kind: input, shape index: {}]   ;;  %s1017_s8 = inlined_call_operand.hbm [shape: f32[2,4,128], index: 8, kind: output, shape index: {}]  }
   0x1   :  { %15 = vsyncpa [#allocation3 + $0x1], 0  ;;  %s883_s27 = smov 0   ;;  %s885_s28 = smov 0  }
   0x2   :  { %s887_s29 = smov 0   ;;  %s889_s30 = smov 0  }
   0x3 LB: > { %s904_s9 = sadd.s32 4294967295, %s832_s30   ;;  %s669_s10 = sadd.s32 4294967294, %s832_s30   ;;  %s832_s30 = sphi %s889_s30, %s1023_s30   ;;  %s828_s29 = sphi %s887_s29, %s1022_s29   ;;  %s824_s28 = sphi %s885_s28, %s1021_s28   ;;  %s820_s27 = sphi %s883_s27, %s1020_s27  }
   0x4   : > { %s908_s11 = sadd.s32 1, %s832_s30   ;;  %s201_s12 = sadd.s32 1, %s828_s29 }
   0x5   : > { %s198_s13 = ssub.s32 %s832_s30, %s908_s11  ;;  %p211_p0 = scmp.ne.s32.totalorder %s828_s29, %s824_s28 }
   0x6   : > { %p199_p1 = scmp.eq.s32.totalorder %s198_s13, 0  ;;  %p212_p2 = scmp.eq.s32.totalorder %s904_s9, 1 }
   0x7   : > { %p217_p3 = scmp.ne.s32.totalorder %s824_s28, %s820_s27  ;;  %p218_p4 = scmp.eq.s32.totalorder %s669_s10, 1 }
   0x8   : > { %s919_s14 = scalar_select %p199_p1, %s828_s29, %s201_s12  }
   0x9   : > { %p921_p5 = por %p212_p2, %p211_p0  ;;  %p925_p6 = por %p218_p4, %p217_p3 }
   0xa   : > { %p672_p7 = scmp.ge.s32.totalorder %s832_s30, 1  ;;  %p265_p8 = scmp.lt.s32.totalorder %s832_s30, 3 }
   0xc   : > { %p266_p9 = pnand %p672_p7, %p265_p8 }
   0xd   : > { %p299_p10 = scmp.lt.s32.totalorder (!%p266_p9), %s904_s9, 1  ;;  %s834_s22 = smov (!%p266_p9), 127  }
   0xe   : > { %269 = sbr.rel (%p266_p9) target bundleno = 990 (0x3de), region = 52  ;;  %s837_s10 = smov (!%p266_p9), 124  }
   0xf   : > { %s296_s19 = sand.u32 (!%p266_p9), 1, %s824_s28  }
  0x10   : > { %s673_s20 = sshll.u32 (!%p266_p9), %s296_s19, 2 }
  0x11   : > { %s298_s25 = scalar_lea.vmem (!%p266_p9), [#allocation2], %s673_s20  ;;  %s790_s20 = scalar_lea.hbm (!%p266_p9), %s1017_s8, 8 }
  0x12   : > { %s607_s26 = sshll.u32 (!%p266_p9), %s298_s25, 4  ;;  %s608_s26 = int_to_ptr.vmem [resolvable:$true] %s607_s26 }
  0x13   : > { %s300_s17 = scalar_select %p299_p10, %s904_s9, 1  ;;  %v310_v7 = vld [vmem:[%s1011_s2] sm:$0xff]  ;;  %v835_v8 = vmov 0   ;;  %v496_v9 = vld [vmem:[%s1015_s6 + $0x8] sm:$0xff]  ;;  %vm330_vm0 = vcmask 1043456   ;;  %vm326_vm1 = vcmask 1039360  }
  0x14   : > { %753 = vset.pattern.permute.xlu0 %v835_v8  ;;  %754 = vset.pattern.permute.xlu1 %v835_v8  ;;  %v311_v10 = vld [vmem:[%s1011_s2 + $0x8] sm:$0xff]  ;;  %v693_v11 = vld [vmem:[%s1010_s1] sm:$0xff]   ;;  %vm343_vm2 = vcmask 64512   ;;  %vm416_vm5 = vcmask 1031168   ;;  %vm430_vm6 = vcmask 130048   ;;  %vm503_vm9 = vcmask 1014784  }
  0x15   : > { %s691_s18 = sshll.u32 %s300_s17, 2  ;;  %760 = vset.pattern.permute.xlu2 %v835_v8  ;;  %340 = vperm.xlu1 %754, %v311_v10   ;;  %v694_v15 = vunpack.c.l.bf16 %v693_v11  ;;  %v695_v16 = vunpack.c.h.bf16 %v693_v11  ;;  %v408_v37 = vld [vmem:[%s1013_s4] sm:$0xff]  ;;  %v409_v38 = vld [vmem:[%s1013_s4 + $0x8] sm:$0xff] }
  0x16   : > { %s303_s21 = scalar_lea.vmem %s1009_s0, %s691_s18  ;;  %s836_s18 = smov 126   ;;  %422 = vperm.xlu2 %760, %v408_v37   ;;  %v495_v39 = vld [vmem:[%s1015_s6] sm:$0xff] }
  0x17   : > { %v304_v0 = vld [vmem:[%s303_s21] sm:$0xf]  ;;  %s688_s21 = sshll.u32 %s904_s9, 2  ;;  %s595_s9 = scalar_lea.sflag [#allocation3], %s296_s19 }
  0x18   : > { %v305_v1 = vunpack.c.l.bf16 %v304_v0  ;;  %v697_v40 = vld [vmem:[%s1012_s3] sm:$0xff]   ;;  %s605_s24 = scalar_lea.hbm %s1017_s8, %s688_s21 }
  0x19   : > { %v698_v44 = vunpack.c.l.bf16 %v697_v40  ;;  %v699_v46 = vunpack.c.h.bf16 %v697_v40  ;;  %v549_v11 = vld [vmem:[%s1016_s7] sm:$0x3] }
  0x1a   : > { %313 = vst [vmem:[#allocation1] ss:$2 sm:$0xff] %v305_v1 }
  0x1e   : > { %427 = vperm.xlu2 %760, %v409_v38  }
  0x21   : > { %v314_v2 = vld.sshfl [vmem:[#allocation1] sm:$0xff pattern:$0x75316420]  ;;  %v315_v3 = vld.sshfl [vmem:[#allocation1 + $0x8] sm:$0xff pattern:$0x75316420] }
  0x22   : > { %319 = vst [vmem:[#allocation1 + $0x1] ss:$2 sm:$0xff] %v305_v1  ;;  %v701_v1 = vld [vmem:[%s1014_s5] sm:$0xff]  }
  0x26   : > { %508 = vperm.xlu2 %760, %v495_v39  }
  0x29   : > { %v320_v4 = vld.sshfl [vmem:[#allocation1] sm:$0xff pattern:$0x75316420]  ;;  %v321_v5 = vld.sshfl [vmem:[#allocation1 + $0x8] sm:$0xff pattern:$0x75316420] }
  0x2a   : > { %v748_v6 = vpack.i.bf16 %v320_v4, %v321_v5  ;;  %v702_v5 = vunpack.c.l.bf16 %v701_v1 }
  0x2c   : > { %749 = vrot.lane.b32.xlu0 %v748_v6, %s834_s22  ;;  %v703_v6 = vunpack.c.h.bf16 %v701_v1 }
  0x34   : > { %335 = vperm.xlu0 %753, %v310_v7  }
  0x3c   : > { %513 = vperm.xlu0 %753, %v496_v9  }
  0x70   : > { %v423_v47 = vpop.permute.xlu2 %422 }
  0x78   : > { %v428_v54 = vpop.permute.xlu2 %427 }
  0x80   : > { %v509_v8 = vpop.permute.xlu2 %508 }
  0x87   : > { %v341_v26 = vpop.permute.xlu1 %340 }
  0x9e   : > { %v750_v12 = vpop.permute.xlu0 %749 }
  0x9f   : > { %v752_v13 = vunpack.i.h.bf16 %v750_v12  ;;  %v751_v14 = vunpack.i.l.bf16 %v750_v12 }
  0xa1   : > { %v332_v17 = vsel %vm330_vm0, %v315_v3, %v751_v14  ;;  %v327_v18 = vsel %vm326_vm1, %v752_v13, %v751_v14 }
  0xa2   : > { %388 = vmatpush.msra.mxu1 %v332_v17  ;;  %v331_v19 = vsel %vm330_vm0, %v314_v2, %v327_v18 }
  0xa3   : > { %365 = vmatpush.msra.mxu0 %v331_v19  ;;  %704 = vmatpush.msra.mxu2 %v331_v19 }
  0xa4   : > { %678 = vmatmul.msk.f32.vlgmr.msra.gmra.mxu1 %vm343_vm2, %v694_v15  ;;  %677 = vmatmul.msk.f32.vlgmr.msra.gmra.mxu2 %vm343_vm2, %v695_v16 }
  0xa5   : > { %676 = vmatmul.msk.f32.vlgmr.msra.gmra.mxu0 %vm343_vm2, %v694_v15 }
  0xa6   : > { %v336_v21 = vpop.permute.xlu0 %335 }
  0xac   : > { %679 = vmatmul.msk.f32.gmra.mxu1 %vm343_vm2, %v695_v16  ;;  %v550_v16 = vunpack.c.l.bf16 %v549_v11 }
  0xae   : > { %v514_v12 = vpop.permute.xlu0 %513 }
 0x121   : > { %v390_v20 = vpop.f32.mrf.mxu1 }
 0x122   : > { %v367_v22 = vpop.f32.mrf.mxu0  ;;  %v391_v23 = vadd.f32 %v390_v20, %v336_v21 }
 0x123   : > { %v368_v24 = vadd.f32 %v367_v22, %v336_v21 }
 0x124   : > { %v399_v27 = vmul.f32 0.01, %v391_v23  ;;  %vm397_vm4 = vcmp.ge.f32.partialorder %v391_v23, 0.0 }
 0x125   : > { %vm396_vm3 = vcmp.ge.f32.partialorder %v368_v24, 0.0  ;;  %v398_v25 = vmul.f32 0.01, %v368_v24 }
 0x126   : > { %v401_v34 = vsel %vm397_vm4, %v391_v23, %v399_v27 }
 0x127   : > { %v370_v28 = vpop.f32.mrf.mxu2  ;;  %v400_v29 = vsel %vm396_vm3, %v368_v24, %v398_v25 }
 0x128   : > { %v371_v30 = vadd.f32 %v370_v28, %v341_v26 }
 0x129   : > { %v393_v31 = vpop.f32.mrf.mxu1 }
 0x12a   : > { %v402_v32 = vadd.f32 %v400_v29, %v371_v30  ;;  %v394_v33 = vadd.f32 %v393_v31, %v341_v26 }
 0x12c   : > { %v403_v35 = vadd.f32 %v401_v34, %v394_v33 }
 0x12e   : > { %v755_v36 = vpack.i.bf16 %v403_v35, %v402_v32 }
 0x130   : > { %756 = vrot.lane.b32.xlu1 %v755_v36, %s836_s18 }
 0x1a2   : > { %v757_v41 = vpop.permute.xlu1 %756 }
 0x1a3   : > { %v758_v42 = vunpack.i.l.bf16 %v757_v41  ;;  %v759_v43 = vunpack.i.h.bf16 %v757_v41 }
 0x1a5   : > { %474 = vmatpush.msra.mxu3 %v759_v43  ;;  %v417_v45 = vsel %vm416_vm5, %v758_v42, %v759_v43 }
 0x1a6   : > { %451 = vmatpush.msrb.mxu2 %v417_v45 }
 0x1a7   : > { %475 = vmatpush.msra.mxu3 %v403_v35 }
 0x1a8   : > { %452 = vmatpush.msrb.mxu2 %v402_v32  ;;  %682 = vmatmul.msk.f32.vlgmr.msra.gmra.mxu3 %vm430_vm6, %v698_v44 }
 0x1a9   : > { %680 = vmatmul.msk.f32.vlgmr.msrb.gmra.mxu2 %vm430_vm6, %v698_v44 }
 0x1b0   : > { %683 = vmatmul.msk.f32.gmra.mxu3 %vm430_vm6, %v699_v46 }
 0x1b1   : > { %681 = vmatmul.msk.f32.gmra.mxu2 %vm430_vm6, %v699_v46 }
 0x22b   : > { %v477_v48 = vpop.f32.mrf.mxu3 }
 0x22c   : > { %v454_v49 = vpop.f32.mrf.mxu2  ;;  %v478_v50 = vadd.f32 %v477_v48, %v423_v47 }
 0x22d   : > { %v455_v51 = vadd.f32 %v454_v49, %v423_v47 }
 0x22e   : > { %v486_v52 = vmul.f32 0.01, %v478_v50  ;;  %vm484_vm7 = vcmp.ge.f32.partialorder %v478_v50, 0.0 }
 0x22f   : > { %v485_v53 = vmul.f32 0.01, %v455_v51  ;;  %vm483_vm8 = vcmp.ge.f32.partialorder %v455_v51, 0.0 }
 0x230   : > { %v488_v58 = vsel %vm484_vm7, %v478_v50, %v486_v52 }
 0x231   : > { %v487_v61 = vsel %vm483_vm8, %v455_v51, %v485_v53 }
 0x233   : > { %v480_v55 = vpop.f32.mrf.mxu3 }
 0x234   : > { %v481_v56 = vadd.f32 %v480_v55, %v428_v54  ;;  %v457_v57 = vpop.f32.mrf.mxu2 }
 0x235   : > { %v458_v59 = vadd.f32 %v457_v57, %v428_v54 }
 0x236   : > { %v490_v60 = vadd.f32 %v488_v58, %v481_v56 }
 0x237   : > { %v489_v62 = vadd.f32 %v487_v61, %v458_v59 }
 0x239   : > { %v761_v63 = vpack.i.bf16 %v490_v60, %v489_v62 }
 0x23b   : > { %762 = vrot.lane.b32.xlu1 %v761_v63, %s837_s10  ;;  %s609_s10 = sshll.u32 %s605_s24, 4  ;;  %s610_s10 = int_to_ptr.hbm [resolvable:$true] %s609_s10 }
 0x23c   : > { %s784_s12 = sshra.s32 %s610_s10, 4  ;;  %s785_s12 = int_to_ptr.hbm [resolvable:$true] %s784_s12 }
 0x23d   : > { %s786_s13 = scalar_lea.hbm %s785_s12, 4  ;;  %p791_p0 = scmp.lt.s32.totalorder %s785_s12, %s1017_s8 }
 0x23e   : > { %p787_p11 = scmp.ne.s32.totalorder %s785_s12, %s786_s13  ;;  %p792_p1 = scmp.lt.s32.totalorder %s790_s20, %s786_s13 }
 0x240   : > { %p788_p12 = pnand %p787_p11, %p921_p5  ;;  %p793_p2 = por %p792_p1, %p791_p0 }
 0x242   : > { %p789_p13 = pneg %p788_p12 }
 0x244   : > { %p794_p3 = pnand %p793_p2, %p789_p13 }
 0x2ad   : > { %v763_v0 = vpop.permute.xlu1 %762 }
 0x2ae   : > { %v765_v2 = vunpack.i.h.bf16 %v763_v0  ;;  %v764_v3 = vunpack.i.l.bf16 %v763_v0 }
 0x2b0   : > { %v504_v4 = vsel %vm503_vm9, %v764_v3, %v765_v2 }
 0x2b1   : > { %536 = vmatpush.msrb.mxu0 %v504_v4 }
 0x2b3   : > { %537 = vmatpush.msrb.mxu0 %v489_v62 }
 0x2b4   : > { %684 = vmatmul.msk.f32.vlgmr.msrb.gmra.mxu0 %vm430_vm6, %v702_v5 }
 0x2bc   : > { %685 = vmatmul.msk.f32.gmra.mxu0 %vm430_vm6, %v703_v6 }
 0x331   : > { %v539_v7 = vpop.f32.mrf.mxu0 }
 0x332   : > { %v540_v9 = vadd.f32 %v539_v7, %v509_v8 }
 0x334   : > { %v546_v10 = vmul.f32 0.01, %v540_v9  ;;  %vm545_vm10 = vcmp.ge.f32.partialorder %v540_v9, 0.0 }
 0x336   : > { %v547_v15 = vsel %vm545_vm10, %v540_v9, %v546_v10 }
 0x339   : > { %v542_v13 = vpop.f32.mrf.mxu0 }
 0x33a   : > { %v543_v14 = vadd.f32 %v542_v13, %v514_v12 }
 0x33c   : > { %v548_v17 = vadd.f32 %v547_v15, %v543_v14 }
 0x33e   : > { %569 = vmatpush.msrb.mxu1 %v548_v17 }
 0x33f   : > { %686 = vmatmul.msk.f32.vlgmr.msrb.gmra.mxu1 %vm343_vm2, %v550_v16 }
 0x3bc   : > { %v571_v18 = vpop.f32.mrf.mxu1 }
 0x3bd   : > { %v574_v19 = vsub.f32 0.0, %v571_v18 }
 0x3bf   : > { %v575_v20 = vmul.f32 1.442695, %v574_v19 }
 0x3c1   : > { %766 = vpow2.f32 %v575_v20 }
 0x3c7   : > { %v767_v21 = vpop.eup %766 }
 0x3c8   : > { %v577_v22 = vadd.f32 1.0, %v767_v21 }
 0x3ca   : > { %768 = vrcp.f32 %v577_v22  ;;  %v589_v26 = vand.u32 2147483648, %v577_v22  ;;  %v587_v28 = vand.u32 2147483647, %v577_v22  ;;  %vm583_vm12 = vweird.f32 %v577_v22 }
 0x3cc   : > { %v590_v30 = vor.u32 1.1754944e-38, %v589_v26  ;;  %vm588_vm14 = vcmp.eq.f32.partialorder %v587_v28, 8.507059e+37 }
 0x3d0   : > { %v769_v23 = vpop.eup %768 }
 0x3d1   : > { %v579_v24 = vmul.f32 %v769_v23, %v577_v22  ;;  %vm584_vm11 = vweird.f32 %v769_v23 }
 0x3d2   : > { %vm585_vm13 = vmor %vm583_vm12, %vm584_vm11 }
 0x3d3   : > { %v580_v25 = vsub.f32 1.0, %v579_v24 }
 0x3d5   : > { %v581_v27 = vmul.f32 %v769_v23, %v580_v25 }
 0x3d7   : > { %v582_v29 = vadd.f32 %v769_v23, %v581_v27 }
 0x3d9   : > { %v586_v31 = vsel %vm585_vm13, %v769_v23, %v582_v29 }
 0x3da   : > { %v591_v32 = vsel %vm588_vm14, %v590_v30, %v586_v31 }
 0x3db   : > { %593 = vst [vmem:[%s298_s25] sm:$0xf] %v591_v32 }
 0x3dc   : > { %797 = shalt.err (!%p794_p3)
}
 0x3dd   : > { %705 = dma.vmem_to_hbm [thread:$0]  (%p921_p5), %s608_s26, 64, %s610_s10, %s595_s9  }
 0x3de PF: > { %p711_p4 = scmp.ge.s32.totalorder %s832_s30, 2  ;;  %s621_s19 = sand.u32 1, %s820_s27  }
 0x3df   : > { %s622_s23 = scalar_lea.sflag [#allocation3], %s621_s19 }
 0x3e0   : > { %p708_p7 = pnand %p711_p4, %p925_p6 }
 0x3e2   : > { %p709_p8 = pneg %p708_p7 }
 0x3e4   : > { %815 = dma.done.wait (%p709_p8), %s622_s23, 64  }
 0x3e5   : > { %817 = vsyncadd (%p709_p8), %s622_s23, 4294967232  ;;  %p18_p9 = scmp.ge.s32.totalorder %s908_s11, 4   ;;  %s1020_s27 = smov %s824_s28 }
 0x3e6   : > { %s1021_s28 = smov %s828_s29  ;;  %s1022_s29 = smov %s919_s14 }
 0x3e7   : > { %s1023_s30 = smov %s908_s11  ;;  %20 = sbr.rel (!%p18_p9) target bundleno = 3 (0x3), region = 88 }
 0x3ec   :  { %628 = vsyncpa [#allocation3], 1 }
 0x3ed   :  { %630 = vsyncpa [#allocation3 + $0x1], 1 }

</bundles_post_ra>
